<compile_context>
chip_gen: v5e
topology: v5e:2x2
jax: 0.10.0
libtpu: 0.0.40
codegen_flags: <defaults>
</compile_context>

<pallas_src>
import functools
import math

import jax
import jax.numpy as jnp
from jax.experimental import pallas as pl
from jax.experimental.pallas import tpu as pltpu


# ----------------------------------------------------------------------------
# Kernels
# ----------------------------------------------------------------------------
def _bl_kernel_bias(x_ref, w_ref, b_ref, o_ref):
    # x_ref: (TB, Gin) native dtype   w_ref: (1, Gin, Gout) matmul dtype
    # b_ref: (1, 1, Gout) f32         o_ref: (TB, Gout)
    x = x_ref[...].astype(w_ref.dtype)            # in-kernel cast: free VPU work
    y = jnp.dot(x, w_ref[0], preferred_element_type=jnp.float32)
    o_ref[...] = (y + b_ref[0]).astype(o_ref.dtype)


def _bl_kernel_nobias(x_ref, w_ref, o_ref):
    x = x_ref[...].astype(w_ref.dtype)
    y = jnp.dot(x, w_ref[0], preferred_element_type=jnp.float32)
    o_ref[...] = y.astype(o_ref.dtype)


# ----------------------------------------------------------------------------
# Hardware / tiling helpers
# ----------------------------------------------------------------------------
def _round_up(x, m):
    return ((x + m - 1) // m) * m


def _sublane_multiple(dtype):
    return {4: 8, 2: 16, 1: 32}.get(jnp.dtype(dtype).itemsize, 8)


@functools.lru_cache(maxsize=1)
def _tpu_info():
    """Returns (vmem_budget, vmem_capacity_or_None, lane_targets, default_scoped)."""
    kind = ""
    try:
        kind = jax.devices()[0].device_kind.lower()
    except Exception:
        pass
    modern = any(t in kind for t in ("v6", "v7", "7x"))   # v6e / v7x
    vmem_cap = None
    try:
        vmem_cap = int(getattr(pltpu.get_tpu_info(), "vmem_capacity_bytes"))
    except Exception:
        vmem_cap = None
    # Tile budget stays under the *default* scoped-VMEM limit (16 MiB on v5e and
    # older, 32 MiB on v6e/v7x) so vmem_limit_bytes rarely needs raising, and is
    # additionally bounded by physical VMEM minus >=16 MiB headroom when known
    # (important on v7x, whose whole TC has only 64 MiB).
    budget = (24 if modern else 12) * 1024 * 1024
    if vmem_cap:
        budget = min(budget, max(vmem_cap - 16 * 1024 * 1024, 8 * 1024 * 1024))
    # v6e/v7x MXU is 2x256x256 -> prefer 256-lane-aligned fused weight tiles;
    # v5e is 4x128x128 -> 128 is native.
    lane_targets = (256, 128) if modern else (128,)
    default_scoped = (32 if modern else 16) * 1024 * 1024
    return budget, vmem_cap, lane_targets, default_scoped


def _choose_group(nb, ibd, obd, lane_targets):
    """Smallest divisor G of n_blocks whose fused (G*ibd, G*obd) block-diagonal
    tile is lane-aligned to one of `lane_targets`.  None -> no divisor works."""
    for target in lane_targets:
        for g in range(1, nb + 1):
            if nb % g == 0 and (g * ibd) % target == 0 and (g * obd) % target == 0:
                return g
    return None


def _choose_batch_tile(B, gin, gout, x_isz, o_isz, w_isz, sub, budget):
    """Largest batch tile whose double-buffered tiles fit the VMEM budget.

    The cap is 8192 rows (up from 1024): each grid step should move multiple
    MiB of x+out traffic so the ~0.35us per-step pipeline overhead is amortized
    (recovers the last 10-15% of HBM roofline, more on v7x's faster HBM).
    """
    fixed = 2 * gin * gout * w_isz + 2 * 8 * gout * 4      # resident weight + bias
    avail = max(budget - fixed, 0)
    per_row = 2 * (gin * x_isz + gout * o_isz)             # double-buffered x + out
    tb = avail // per_row if per_row else sub
    tb = min(tb, 8192, _round_up(B, sub))
    tb = max(sub, (tb // sub) * sub)
    return int(tb)


# ----------------------------------------------------------------------------
# Public wrapper
# ----------------------------------------------------------------------------
def block_linear(x, weight, bias=None, *, batch_tile=None, precision=None):
    """Pallas implementation of BlockLinear.forward.

    x:      (N, ..., n_blocks * in_block_dim)
    weight: (n_blocks, out_block_dim, in_block_dim)
    bias:   (n_blocks * out_block_dim,) or None
    precision: None (full precision) or "bf16" (cast matmul inputs to bf16,
               keep f32 accumulation / f32 bias add).
    returns (N, ..., n_blocks * out_block_dim)
    """
    nb, obd, ibd = weight.shape
    lead = x.shape[:-1]
    if x.shape[-1] != nb * ibd:
        raise ValueError("last dim of x must equal n_blocks * in_block_dim")
    B = int(math.prod(lead)) if lead else 1
    out_dtype = jnp.result_type(x.dtype, weight.dtype)

    def _dense_fallback():
        xb = x.reshape(*lead, nb, ibd)
        y = jnp.einsum("...ki,koi->...ko", xb, weight)
        y = y.reshape(*lead, nb * obd).astype(out_dtype)
        if bias is not None:
            y = y + bias.astype(out_dtype)
        return y

    # Tiny problems: launch / per-step overhead dominates -> dense einsum.
    if B < 8 or nb * ibd * obd <= 64:
        return _dense_fallback()

    budget, vmem_cap, lane_targets, default_scoped = _tpu_info()

    if precision in ("bf16", "bfloat16"):
        mm_dtype = jnp.bfloat16                    # MXU-input dtype (f32 acc kept)
    else:
        mm_dtype = out_dtype
    x_isz = jnp.dtype(x.dtype).itemsize
    w_isz = jnp.dtype(mm_dtype).itemsize
    o_isz = jnp.dtype(out_dtype).itemsize

    # ---- feature-axis tiling: fused block groups or per-block zero padding ---
    G = _choose_group(nb, ibd, obd, lane_targets)
    if G is not None:
        ng, gin, gout = nb // G, G * ibd, G * obd
        pad_in = pad_o = 0
    else:
        # No divisor of n_blocks reaches lane alignment: zero-pad each block to
        # 128 multiples and run per-block (O(nb) padding, never the old O(nb^2)
        # dense block-diag fallback that could blow VMEM for large nb).
        ng, G = nb, 1
        gin, gout = _round_up(ibd, 128), _round_up(obd, 128)
        pad_in, pad_o = gin - ibd, gout - obd

    # TODO(synk): tile the per-block K/N dims instead of bailing to XLA when a
    # single fused weight tile would not fit the VMEM budget.
    if 2 * gin * gout * w_isz > (3 * budget) // 4:
        return _dense_fallback()

    # Weight packing is a tiny one-off wrapper op over the (small) weights;
    # callers doing repeated inference can hoist it, x itself is never copied.
    wT = jnp.transpose(weight, (0, 2, 1)).astype(mm_dtype)   # (nb, ibd, obd)
    if G > 1:
        eye = jnp.eye(G, dtype=mm_dtype)
        wbd = jnp.einsum("gaio,ac->gaico",
                         wT.reshape(ng, G, ibd, obd), eye).reshape(ng, gin, gout)
    elif pad_in or pad_o:
        wbd = jnp.pad(wT, ((0, 0), (0, pad_in), (0, pad_o)))
    else:
        wbd = wT                                            # (ng, gin, gout)

    if pad_in:
        x2 = jnp.pad(x.reshape(B, nb, ibd),
                     ((0, 0), (0, 0), (0, pad_in))).reshape(B, ng * gin)
    else:
        x2 = x.reshape(B, nb * ibd)                         # free, native dtype

    b3 = None
    if bias is not None:
        bb = bias.astype(jnp.float32).reshape(nb, obd)      # keep bias in f32
        if pad_o:
            bb = jnp.pad(bb, ((0, 0), (0, pad_o)))
        b3 = bb.reshape(ng, 1, gout)

    # ---- batch tile ----------------------------------------------------------
    sub = _sublane_multiple(x.dtype)
    if batch_tile is None:
        tb = _choose_batch_tile(B, gin, gout, x_isz, o_isz, w_isz, sub, budget)
        nbt = pl.cdiv(B, tb)
        # v7x has 2 TensorCores: prefer an even batch-tile count so the sharded
        # axis balances (neutral on 1-TC v5e/v6e).
        if nbt > 1 and nbt % 2 == 1 and ng % 2 == 1:
            tb_even = max(sub, _round_up(pl.cdiv(B, nbt + 1), sub))
            if pl.cdiv(B, tb_even) % 2 == 0:
                tb = tb_even
    else:
        tb = max(sub, (min(int(batch_tile), _round_up(B, sub)) // sub) * sub)
    nbt = pl.cdiv(B, tb)

    # ---- compiler params / cost ----------------------------------------------
    step_bytes = (2 * tb * (gin * x_isz + gout * o_isz)
                  + 2 * gin * gout * w_isz + 2 * 8 * gout * 4)
    vmem_limit = None
    if step_bytes > default_scoped - 2 * 1024 * 1024:
        # Cap by physical VMEM minus headroom (never the full 64 MiB on v7x).
        cap = (vmem_cap - 16 * 1024 * 1024) if vmem_cap else 48 * 1024 * 1024
        vmem_limit = int(min(cap, max(step_bytes * 3 // 2,
                                      step_bytes + 2 * 1024 * 1024)))
    compiler_params = pltpu.CompilerParams(
        dimension_semantics=("parallel", "parallel"),
        **({"vmem_limit_bytes": vmem_limit} if vmem_limit else {}))

    cost = pl.CostEstimate(
        flops=2 * B * ng * gin * gout,         # actual MXU work incl. zero padding
        transcendentals=0,
        bytes_accessed=int(B * ng * gin * x_isz
                           + ng * gin * gout * w_isz
                           + B * ng * gout * o_isz
                           + (ng * gout * 4 if bias is not None else 0)))

    # Grid: group axis outer, batch-tile axis inner (fastest). Weight/bias
    # index_maps ignore the batch index -> tiles stay resident across b.
    x_spec = pl.BlockSpec((tb, gin), lambda g, b: (b, g))
    w_spec = pl.BlockSpec((1, gin, gout), lambda g, b: (g, 0, 0))
    o_spec = pl.BlockSpec((tb, gout), lambda g, b: (b, g))

    if bias is not None:
        b_spec = pl.BlockSpec((1, 1, gout), lambda g, b: (g, 0, 0))
        out2 = pl.pallas_call(
            _bl_kernel_bias,
            out_shape=jax.ShapeDtypeStruct((B, ng * gout), out_dtype),
            grid_spec=pltpu.PrefetchScalarGridSpec(
                num_scalar_prefetch=0, grid=(ng, nbt),
                in_specs=[x_spec, w_spec, b_spec], out_specs=o_spec),
            compiler_params=compiler_params,
            cost_estimate=cost,
        )(x2, wbd, b3)
    else:
        out2 = pl.pallas_call(
            _bl_kernel_nobias,
            out_shape=jax.ShapeDtypeStruct((B, ng * gout), out_dtype),
            grid_spec=pltpu.PrefetchScalarGridSpec(
                num_scalar_prefetch=0, grid=(ng, nbt),
                in_specs=[x_spec, w_spec], out_specs=o_spec),
            compiler_params=compiler_params,
            cost_estimate=cost,
        )(x2, wbd)

    if pad_o:
        out2 = out2.reshape(B, nb, gout)[:, :, :obd].reshape(B, nb * obd)
    return out2.reshape(*lead, nb * obd)


# ----------------------------------------------------------------------------
# Parameter init (mirrors the PyTorch module's shapes / bounds)
# ----------------------------------------------------------------------------
def init_block_linear_params(key, in_block_dim, out_block_dim, n_blocks,
                             use_bias=True, dtype=jnp.float32):
    kw, kb = jax.random.split(key)
    fan_in = out_block_dim * in_block_dim     # torch fan-in on (nb, out, in)
    bound = 1.0 / math.sqrt(fan_in)
    weight = jax.random.uniform(
        kw, (n_blocks, out_block_dim, in_block_dim),
        minval=-bound, maxval=bound, dtype=dtype)
    bias = None
    if use_bias:
        bias = jax.random.uniform(
            kb, (n_blocks * out_block_dim,),
            minval=-bound, maxval=bound, dtype=dtype)
    return weight, bias


def _reference_block_linear(x, weight, bias):
    """Pure-JAX reference: F.linear(x, block_diag(weight), bias)."""
    nb, obd, ibd = weight.shape
    lead = x.shape[:-1]
    xb = x.reshape(*lead, nb, ibd)
    y = jnp.einsum("...ki,koi->...ko", xb, weight)
    y = y.reshape(*lead, nb * obd)
    if bias is not None:
        y = y + bias
    return y


if __name__ == "__main__":
    key = jax.random.PRNGKey(0)

    configs = [
        # (lead_shape, in_block_dim, out_block_dim, n_blocks, use_bias)
        ((4, 16), 32, 32, 4, True),    # small blocks fused into one lane-dense tile
        ((2, 8), 128, 128, 2, True),   # 128-aligned blocks (G=1 on v5e, G=2 on v6e/v7x)
        ((3, 7), 32, 32, 4, False),    # no-bias path + ragged batch tile
        ((2, 5), 24, 40, 3, True),     # unaligned blocks -> padded per-block path
    ]

    fwd = jax.jit(block_linear)
    for i, (lead, ibd, obd, nb, use_bias) in enumerate(configs):
        kx, kp, key = jax.random.split(key, 3)
        x = jax.random.normal(kx, lead + (nb * ibd,), dtype=jnp.float32)
        weight, bias = init_block_linear_params(
            kp, ibd, obd, nb, use_bias=use_bias)

        y = jax.block_until_ready(fwd(x, weight, bias))
        y_ref = _reference_block_linear(x, weight, bias)

        assert y.shape == lead + (nb * obd,), (i, y.shape)
        assert jnp.allclose(y, y_ref, atol=1e-5, rtol=1e-5), \
            f"mismatch vs reference in config {i}"

    print("KERNEL_OK")
</pallas_src>

<mosaic_0001>
module attributes {stable_mosaic.version = 11 : i64} {
  func.func @_bl_kernel_bias(%arg0: i32, %arg1: i32, %arg2: memref<64x128xf32, #tpu.memory_space<vmem>>, %arg3: memref<1x128x128xf32, #tpu.memory_space<vmem>>, %arg4: memref<1x1x128xf32, #tpu.memory_space<vmem>>, %arg5: memref<64x128xf32, #tpu.memory_space<vmem>>) attributes {dimension_semantics = [#tpu.dimension_semantics<parallel>, #tpu.dimension_semantics<parallel>], iteration_bounds = array<i64: 1, 1>, scalar_prefetch = 0 : i64, scratch_operands = 0 : i64, tpu.core_type = #tpu.core_type<tc>, window_params = [{transform_indices = @transform_0, window_bounds = array<i64: 64, 128>}, {transform_indices = @transform_1, window_bounds = array<i64: 1, 128, 128>}, {transform_indices = @transform_2, window_bounds = array<i64: 1, 1, 128>}, {transform_indices = @transform_3, window_bounds = array<i64: 64, 128>}]} {
    %c0 = arith.constant 0 : index
    %c0_0 = arith.constant 0 : index
    %0 = vector.load %arg2[%c0, %c0_0] : memref<64x128xf32, #tpu.memory_space<vmem>>, vector<64x128xf32>
    %c0_1 = arith.constant 0 : index
    %c0_2 = arith.constant 0 : index
    %c0_3 = arith.constant 0 : index
    %1 = vector.load %arg3[%c0_1, %c0_2, %c0_3] : memref<1x128x128xf32, #tpu.memory_space<vmem>>, vector<1x128x128xf32>
    %2 = vector.shape_cast %1 : vector<1x128x128xf32> to vector<128x128xf32>
    %cst = arith.constant dense<0.000000e+00> : vector<64x128xf32>
    %3 = tpu.matmul %0, %2, %cst {dimension_numbers = #tpu.dot_dimension_numbers<[1], [0], [0], [1], [0, 0, 1, 1], [], []>} : vector<64x128xf32>, vector<128x128xf32>, vector<64x128xf32> -> vector<64x128xf32>
    %c0_4 = arith.constant 0 : index
    %c0_5 = arith.constant 0 : index
    %c0_6 = arith.constant 0 : index
    %4 = vector.load %arg4[%c0_4, %c0_5, %c0_6] : memref<1x1x128xf32, #tpu.memory_space<vmem>>, vector<1x1x128xf32>
    %5 = vector.shape_cast %4 : vector<1x1x128xf32> to vector<1x128xf32>
    %6 = vector.broadcast %5 : vector<1x128xf32> to vector<64x128xf32>
    %7 = arith.addf %3, %6 : vector<64x128xf32>
    %c0_7 = arith.constant 0 : index
    %c0_8 = arith.constant 0 : index
    %8 = vector.load %arg5[%c0_7, %c0_8] : memref<64x128xf32, #tpu.memory_space<vmem>>, vector<64x128xf32>
    tpu.vector_store %arg5[%c0_7, %c0_8], %7 {strides = array<i32>} : memref<64x128xf32, #tpu.memory_space<vmem>>, vector<64x128xf32>,
    return
  }
  func.func @transform_0(%arg0: i32, %arg1: i32) -> (i32, i32) {
    %c0_i32 = arith.constant 0 : i32
    return %arg1, %arg0 : i32, i32
  }
  func.func @transform_1(%arg0: i32, %arg1: i32) -> (i32, i32, i32) {
    %c0_i32 = arith.constant 0 : i32
    %c0_i32_0 = arith.constant 0 : i32
    %c0_i32_1 = arith.constant 0 : i32
    return %arg0, %c0_i32, %c0_i32_0 : i32, i32, i32
  }
  func.func @transform_2(%arg0: i32, %arg1: i32) -> (i32, i32, i32) {
    %c0_i32 = arith.constant 0 : i32
    %c0_i32_0 = arith.constant 0 : i32
    %c0_i32_1 = arith.constant 0 : i32
    return %arg0, %c0_i32, %c0_i32_0 : i32, i32, i32
  }
  func.func @transform_3(%arg0: i32, %arg1: i32) -> (i32, i32) {
    %c0_i32 = arith.constant 0 : i32
    return %arg1, %arg0 : i32, i32
  }
}

</mosaic_0001>

<bundles_post_ra>
// kernel: block_linear.1
= control target key start
LH: loop header
LB: loop body
LE: loop exit
PB: predicated region body
PF: predicated region fallthrough
CT: control target
= control target key end

     0   :  { %s289_s0 = inlined_call_operand.vmem [shape: f32[64,128], index: 0, kind: input, shape index: {}]   ;;  %s290_s1 = inlined_call_operand.vmem [shape: f32[1,128,128], index: 1, kind: input, shape index: {}]   ;;  %s291_s2 = inlined_call_operand.vmem [shape: f32[1,1,128], index: 2, kind: input, shape index: {}]   ;;  %s292_s3 = inlined_call_operand.hbm [shape: f32[64,128], index: 3, kind: output, shape index: {}]  }
   0x1   :  { %v38_v0 = vld [vmem:[%s290_s1 + $0x78] sm:$0xff]  ;;  %v37_v1 = vld [vmem:[%s290_s1 + $0x70] sm:$0xff]  ;;  %v36_v2 = vld [vmem:[%s290_s1 + $0x68] sm:$0xff] }
   0x2   :  { %111 = vmatpush.msra.mxu2 %v38_v0  ;;  %112 = vmatpush.msra.mxu3 %v38_v0  ;;  %v35_v3 = vld [vmem:[%s290_s1 + $0x60] sm:$0xff]  ;;  %v34_v4 = vld [vmem:[%s290_s1 + $0x58] sm:$0xff] }
   0x3   :  { %43 = vmatpush.msra.mxu0 %v38_v0  ;;  %110 = vmatpush.msra.mxu1 %v38_v0 }
   0x4   :  { %114 = vmatpush.msra.mxu2 %v37_v1  ;;  %115 = vmatpush.msra.mxu3 %v37_v1 }
   0x5   :  { %44 = vmatpush.msra.mxu0 %v37_v1  ;;  %113 = vmatpush.msra.mxu1 %v37_v1 }
   0x6   :  { %117 = vmatpush.msra.mxu2 %v36_v2  ;;  %118 = vmatpush.msra.mxu3 %v36_v2 }
   0x7   :  { %45 = vmatpush.msra.mxu0 %v36_v2  ;;  %116 = vmatpush.msra.mxu1 %v36_v2 }
   0x8   :  { %120 = vmatpush.msra.mxu2 %v35_v3  ;;  %121 = vmatpush.msra.mxu3 %v35_v3 }
   0x9   :  { %8 = vsyncpa [#allocation3], 0  ;;  %v33_v5 = vld [vmem:[%s290_s1 + $0x50] sm:$0xff]  ;;  %46 = vmatpush.msra.mxu0 %v35_v3  ;;  %119 = vmatpush.msra.mxu1 %v35_v3  ;;  %v32_v6 = vld [vmem:[%s290_s1 + $0x48] sm:$0xff]  ;;  %s98_s9 = sshll.u32 %s292_s3, 4  ;;  %s189_s10 = smov 128   ;;  %s99_s9 = int_to_ptr.hbm [resolvable:$true] %s98_s9 }
   0xa   :  { %123 = vmatpush.msra.mxu2 %v34_v4  ;;  %124 = vmatpush.msra.mxu3 %v34_v4  ;;  %v31_v7 = vld [vmem:[%s290_s1 + $0x40] sm:$0xff]  ;;  %v30_v8 = vld [vmem:[%s290_s1 + $0x38] sm:$0xff]  ;;  %v29_v9 = vld [vmem:[%s290_s1 + $0x30] sm:$0xff]  ;;  %s190_s11 = smov 8  }
   0xb   :  { %47 = vmatpush.msra.mxu0 %v34_v4  ;;  %122 = vmatpush.msra.mxu1 %v34_v4  ;;  %v28_v10 = vld [vmem:[%s290_s1 + $0x28] sm:$0xff]  ;;  %v27_v11 = vld [vmem:[%s290_s1 + $0x20] sm:$0xff]  ;;  %v26_v12 = vld [vmem:[%s290_s1 + $0x18] sm:$0xff] }
   0xc   :  { %126 = vmatpush.msra.mxu2 %v33_v5  ;;  %127 = vmatpush.msra.mxu3 %v33_v5  ;;  %v25_v13 = vld [vmem:[%s290_s1 + $0x10] sm:$0xff]  ;;  %v24_v14 = vld [vmem:[%s290_s1 + $0x8] sm:$0xff]  ;;  %v23_v15 = vld [vmem:[%s290_s1] sm:$0xff] }
   0xd   :  { %48 = vmatpush.msra.mxu0 %v33_v5  ;;  %125 = vmatpush.msra.mxu1 %v33_v5  ;;  %v19_v16 = vld [vmem:[%s289_s0 + $0x20] sm:$0xff]  ;;  %v21_v17 = vld [vmem:[%s289_s0 + $0x30] sm:$0xff]  ;;  %v20_v20 = vld [vmem:[%s289_s0 + $0x28] sm:$0xff] }
   0xe   :  { %129 = vmatpush.msra.mxu2 %v32_v6  ;;  %130 = vmatpush.msra.mxu3 %v32_v6  ;;  %v15_v18 = vld [vmem:[%s289_s0] sm:$0xff]  ;;  %v17_v19 = vld [vmem:[%s289_s0 + $0x10] sm:$0xff]  ;;  %v22_v21 = vld [vmem:[%s289_s0 + $0x38] sm:$0xff] }
   0xf   :  { %49 = vmatpush.msra.mxu0 %v32_v6  ;;  %128 = vmatpush.msra.mxu1 %v32_v6  ;;  %v16_v22 = vld [vmem:[%s289_s0 + $0x8] sm:$0xff]  ;;  %v18_v23 = vld [vmem:[%s289_s0 + $0x18] sm:$0xff]  ;;  %v161_v24 = vld [vmem:[%s291_s2] ss:$0 sm:$0xff]  ;;  %s188_s0 = smov [#allocation2]  }
  0x10   :  { %132 = vmatpush.msra.mxu2 %v31_v7  ;;  %133 = vmatpush.msra.mxu3 %v31_v7  ;;  %s96_s7 = sshll.u32 %s188_s0, 4  ;;  %s97_s7 = int_to_ptr.vmem [resolvable:$true] %s96_s7 }
  0x11   :  { %50 = vmatpush.msra.mxu0 %v31_v7  ;;  %131 = vmatpush.msra.mxu1 %v31_v7 }
  0x12   :  { %135 = vmatpush.msra.mxu2 %v30_v8  ;;  %136 = vmatpush.msra.mxu3 %v30_v8 }
  0x13   :  { %51 = vmatpush.msra.mxu0 %v30_v8  ;;  %134 = vmatpush.msra.mxu1 %v30_v8 }
  0x14   :  { %138 = vmatpush.msra.mxu2 %v29_v9  ;;  %139 = vmatpush.msra.mxu3 %v29_v9 }
  0x15   :  { %52 = vmatpush.msra.mxu0 %v29_v9  ;;  %137 = vmatpush.msra.mxu1 %v29_v9 }
  0x16   :  { %141 = vmatpush.msra.mxu2 %v28_v10  ;;  %142 = vmatpush.msra.mxu3 %v28_v10 }
  0x17   :  { %53 = vmatpush.msra.mxu0 %v28_v10  ;;  %140 = vmatpush.msra.mxu1 %v28_v10 }
  0x18   :  { %144 = vmatpush.msra.mxu2 %v27_v11  ;;  %145 = vmatpush.msra.mxu3 %v27_v11 }
  0x19   :  { %54 = vmatpush.msra.mxu0 %v27_v11  ;;  %143 = vmatpush.msra.mxu1 %v27_v11 }
  0x1a   :  { %147 = vmatpush.msra.mxu2 %v26_v12  ;;  %148 = vmatpush.msra.mxu3 %v26_v12 }
  0x1b   :  { %55 = vmatpush.msra.mxu0 %v26_v12  ;;  %146 = vmatpush.msra.mxu1 %v26_v12 }
  0x1c   :  { %150 = vmatpush.msra.mxu2 %v25_v13  ;;  %151 = vmatpush.msra.mxu3 %v25_v13 }
  0x1d   :  { %56 = vmatpush.msra.mxu0 %v25_v13  ;;  %149 = vmatpush.msra.mxu1 %v25_v13 }
  0x1e   :  { %153 = vmatpush.msra.mxu2 %v24_v14  ;;  %154 = vmatpush.msra.mxu3 %v24_v14 }
  0x1f   :  { %57 = vmatpush.msra.mxu0 %v24_v14  ;;  %152 = vmatpush.msra.mxu1 %v24_v14 }
  0x20   :  { %156 = vmatpush.msra.mxu2 %v23_v15  ;;  %157 = vmatpush.msra.mxu3 %v23_v15 }
  0x21   :  { %71 = vmatmul.f32.vlgmr.msra.gmra.mxu2 %v19_v16  ;;  %77 = vmatmul.f32.vlgmr.msra.gmra.mxu3 %v21_v17 }
  0x22   :  { %58 = vmatpush.msra.mxu0 %v23_v15  ;;  %155 = vmatpush.msra.mxu1 %v23_v15 }
  0x23   :  { %59 = vmatmul.f32.vlgmr.msra.gmra.mxu0 %v15_v18  ;;  %65 = vmatmul.f32.vlgmr.msra.gmra.mxu1 %v17_v19 }
  0x29   :  { %74 = vmatmul.f32.gmra.mxu2 %v20_v20  ;;  %80 = vmatmul.f32.gmra.mxu3 %v22_v21 }
  0x2b   :  { %62 = vmatmul.f32.gmra.mxu0 %v16_v22  ;;  %68 = vmatmul.f32.gmra.mxu1 %v18_v23 }
  0xa0   :  { %v60_v25 = vpop.f32.mrf.mxu0  ;;  %v66_v26 = vpop.f32.mrf.mxu1 }
  0xa1   :  { %v61_v27 = vadd.f32 %v161_v24, %v60_v25  ;;  %v67_v28 = vadd.f32 %v161_v24, %v66_v26 }
  0xa3   :  { %84 = vst [vmem:[#allocation2] sm:$0xff] %v61_v27 }
  0xa4   :  { %86 = vst [vmem:[#allocation2 + $0x10] sm:$0xff] %v67_v28  ;;  %v72_v29 = vpop.f32.mrf.mxu2  ;;  %v78_v30 = vpop.f32.mrf.mxu3 }
  0xa5   :  { %v73_v31 = vadd.f32 %v161_v24, %v72_v29  ;;  %v79_v32 = vadd.f32 %v161_v24, %v78_v30 }
  0xa7   :  { %88 = vst [vmem:[#allocation2 + $0x20] sm:$0xff] %v73_v31 }
  0xa8   :  { %90 = vst [vmem:[#allocation2 + $0x30] sm:$0xff] %v79_v32  ;;  %v63_v33 = vpop.f32.mrf.mxu0  ;;  %v69_v34 = vpop.f32.mrf.mxu1 }
  0xa9   :  { %v64_v35 = vadd.f32 %v161_v24, %v63_v33  ;;  %v70_v36 = vadd.f32 %v161_v24, %v69_v34 }
  0xab   :  { %85 = vst [vmem:[#allocation2 + $0x8] sm:$0xff] %v64_v35 }
  0xac   :  { %87 = vst [vmem:[#allocation2 + $0x18] sm:$0xff] %v70_v36  ;;  %v75_v37 = vpop.f32.mrf.mxu2  ;;  %v81_v38 = vpop.f32.mrf.mxu3 }
  0xad   :  { %v76_v39 = vadd.f32 %v161_v24, %v75_v37  ;;  %v82_v40 = vadd.f32 %v161_v24, %v81_v38 }
  0xaf   :  { %89 = vst [vmem:[#allocation2 + $0x28] sm:$0xff] %v76_v39 }
  0xb0   :  { %91 = vst [vmem:[#allocation2 + $0x38] sm:$0xff] %v82_v40 }
  0xb1   :  { %104 = dma.vmem_to_hbm [thread:$0]  %s97_s7, 1024, %s99_s9, [#allocation3], %s189_s10, %s189_s10, %s190_s11  }
  0xb2   :  { %186 = dma.done.wait [#allocation3], 1024  }
  0xb3   :  { %187 = vsyncadd [#allocation3], 4294966272 }
  0xb4   :  { %109 = vsyncpa [#allocation3], 1 }

</bundles_post_ra>
